<compile_context>
chip_gen: v5e
topology: v5e:2x2
jax: 0.10.0
libtpu: 0.0.40
codegen_flags: <defaults>
</compile_context>

<pallas_src>
import jax
import jax.numpy as jnp
from jax import lax
from jax.experimental import pallas as pl
from jax.experimental.pallas import tpu as pltpu

FEAT = 50   # input / hidden width of the PyTorch module
PAD = 64    # padded hidden width inside the kernel (sublane aligned)


def _round_up(n, m):
    return (n + m - 1) // m * m


def _mlp_kernel(x_ref, w1_ref, b1_ref, w2_ref, b2_ref, w3_ref, b3_ref, o_ref):
    # x_ref : (TB, 50)   bf16  batch tile, natural HBM layout (feature last)
    # w1_ref: (64, 50)   bf16  Linear1 weight (out, in), out dim zero-padded 50->64
    # b1_ref: (64, 1)    f32
    # w2_ref: (64, 64)   bf16  Linear2 weight, zero-padded
    # b2_ref: (64, 1)    f32
    # w3_ref: (64, 1)    f32   Linear3 weight as a column, zero-padded
    # b3_ref: (1, 1)     f32
    # o_ref : (1, 1, TB) f32   lane-dense output (batch on the lane axis)
    x = x_ref[...]                                       # (TB, 50) bf16

    # h1^T = W1 @ x^T : contract the feature axis of both operands; the MXU
    # consumes the transposed rhs directly, keeping batch on the lane axis.
    h1 = lax.dot_general(
        w1_ref[...], x,
        dimension_numbers=(((1,), (1,)), ((), ())),
        preferred_element_type=jnp.float32)              # (64, TB) f32
    h1 = jnp.maximum(h1 + b1_ref[...], 0.0)              # bias + ReLU in f32

    h2 = jnp.dot(w2_ref[...], h1.astype(jnp.bfloat16),
                 preferred_element_type=jnp.float32)     # (64, TB) f32
    h2 = jnp.maximum(h2 + b2_ref[...], 0.0)

    # Final 50->1 projection: VPU multiply + sublane reduction (no N=1 MXU pass),
    # result is already lane-dense (1, TB).
    out = jnp.sum(h2 * w3_ref[...], axis=0, keepdims=True) + b3_ref[...]
    o_ref[0, :, :] = out.astype(o_ref.dtype)


def neural_network_forward(x, kernel_params, *, tb=1024):
    """x: (B, 50) (or anything flattening to 50 features per row).
    Returns logits of shape (B, 1, 1) like the PyTorch module."""
    w1, b1, w2, b2, w3, b3 = kernel_params
    B = x.shape[0]
    x = x.reshape(B, FEAT).astype(jnp.bfloat16)

    # Batch tile: multiple of 16 (bf16 sublane packing), no larger than needed.
    tb = max(16, min(_round_up(tb, 16), _round_up(B, 16)))
    num_tiles = pl.cdiv(B, tb)
    bp = num_tiles * tb
    if bp != B:                       # ragged batch: pad rows, sliced off below
        x = jnp.pad(x, ((0, bp - B), (0, 0)))

    flops = 2 * B * (FEAT * FEAT + FEAT * FEAT + FEAT)
    bytes_accessed = (bp * FEAT * 2 + bp * 4
                      + (w1.size + w2.size) * 2
                      + (b1.size + b2.size + w3.size + b3.size) * 4)

    out = pl.pallas_call(
        _mlp_kernel,
        out_shape=jax.ShapeDtypeStruct((num_tiles, 1, tb), jnp.float32),
        grid=(num_tiles,),
        in_specs=[
            pl.BlockSpec((tb, FEAT), lambda i: (i, 0)),    # x: new tile each step
            pl.BlockSpec((PAD, FEAT), lambda i: (0, 0)),   # weights/biases stay resident
            pl.BlockSpec((PAD, 1), lambda i: (0, 0)),
            pl.BlockSpec((PAD, PAD), lambda i: (0, 0)),
            pl.BlockSpec((PAD, 1), lambda i: (0, 0)),
            pl.BlockSpec((PAD, 1), lambda i: (0, 0)),
            pl.BlockSpec((1, 1), lambda i: (0, 0)),
        ],
        out_specs=pl.BlockSpec((1, 1, tb), lambda i: (i, 0, 0)),
        compiler_params=pltpu.CompilerParams(
            dimension_semantics=("parallel",),             # shard tiles over v7x's 2 TCs
            vmem_limit_bytes=32 * 1024 * 1024,             # ~1 MiB/step actually used
        ),
        cost_estimate=pl.CostEstimate(
            flops=flops, transcendentals=0, bytes_accessed=bytes_accessed),
    )(x, w1, b1, w2, b2, w3, b3)

    return out.reshape(bp)[:B].reshape(B, 1, 1)


def init_params(key):
    """Deterministic init with PyTorch nn.Linear layouts: W is (out, in), b is (out,)."""
    ks = jax.random.split(key, 6)
    w1 = jax.random.normal(ks[0], (FEAT, FEAT), jnp.float32) * 0.1
    b1 = jax.random.normal(ks[1], (FEAT,), jnp.float32) * 0.1
    w2 = jax.random.normal(ks[2], (FEAT, FEAT), jnp.float32) * 0.1
    b2 = jax.random.normal(ks[3], (FEAT,), jnp.float32) * 0.1
    w3 = jax.random.normal(ks[4], (1, FEAT), jnp.float32) * 0.1
    b3 = jax.random.normal(ks[5], (1,), jnp.float32) * 0.1
    return (w1, b1, w2, b2, w3, b3)


def prepare_params(raw):
    """Zero-pad the hidden width 50 -> 64 and cast the matmul weights to bf16."""
    w1, b1, w2, b2, w3, b3 = raw
    w1p = jnp.zeros((PAD, FEAT), jnp.float32).at[:FEAT, :].set(w1).astype(jnp.bfloat16)
    b1p = jnp.zeros((PAD, 1), jnp.float32).at[:FEAT, 0].set(b1)
    w2p = jnp.zeros((PAD, PAD), jnp.float32).at[:FEAT, :FEAT].set(w2).astype(jnp.bfloat16)
    b2p = jnp.zeros((PAD, 1), jnp.float32).at[:FEAT, 0].set(b2)
    w3p = jnp.zeros((PAD, 1), jnp.float32).at[:FEAT, 0].set(w3.reshape(FEAT))
    b3p = b3.reshape(1, 1).astype(jnp.float32)
    return (w1p, b1p, w2p, b2p, w3p, b3p)


def _reference_forward(x, raw):
    """Plain f32 reference of the PyTorch forward."""
    w1, b1, w2, b2, w3, b3 = raw
    hp = lax.Precision.HIGHEST
    h = jnp.maximum(jnp.dot(x, w1.T, precision=hp) + b1, 0.0)
    h = jnp.maximum(jnp.dot(h, w2.T, precision=hp) + b2, 0.0)
    out = jnp.dot(h, w3.T, precision=hp) + b3
    return out.reshape(x.shape[0], 1, 1)


def _reference_forward_bf16(x, raw):
    """Reference with the same bf16 quantization points as the kernel."""
    w1, b1, w2, b2, w3, b3 = raw
    hp = lax.Precision.HIGHEST
    q = lambda a: a.astype(jnp.bfloat16).astype(jnp.float32)
    h = jnp.maximum(jnp.dot(q(x), q(w1).T, precision=hp) + b1, 0.0)
    h = jnp.maximum(jnp.dot(q(h), q(w2).T, precision=hp) + b2, 0.0)
    out = jnp.dot(h, w3.T, precision=hp) + b3
    return out.reshape(x.shape[0], 1, 1)


if __name__ == "__main__":
    key = jax.random.PRNGKey(0)
    kx, kp = jax.random.split(key)

    B = 256                                    # small demo batch -> 2 grid tiles of 128
    x = jax.random.normal(kx, (B, FEAT), jnp.float32)
    raw = init_params(kp)
    kparams = prepare_params(raw)

    fwd = jax.jit(lambda xx, pp: neural_network_forward(xx, pp, tb=128))
    logits = jax.block_until_ready(fwd(x, kparams))

    assert logits.shape == (B, 1, 1), logits.shape

    ref_q = _reference_forward_bf16(x, raw)    # same quantization points as the kernel
    ref_f = _reference_forward(x, raw)         # pure f32 semantic reference
    err_q = float(jnp.max(jnp.abs(logits - ref_q)))
    err_f = float(jnp.max(jnp.abs(logits - ref_f)))
    assert err_q < 5e-3, f"mismatch vs bf16-quantized reference: {err_q}"
    assert err_f < 1e-1, f"mismatch vs f32 reference: {err_f}"

    print("KERNEL_OK")
</pallas_src>

<mosaic_0001>
module attributes {stable_mosaic.version = 11 : i64} {
  func.func @_mlp_kernel(%arg0: i32, %arg1: memref<128x50xbf16, #tpu.memory_space<vmem>>, %arg2: memref<64x50xbf16, #tpu.memory_space<vmem>>, %arg3: memref<64x1xf32, #tpu.memory_space<vmem>>, %arg4: memref<64x64xbf16, #tpu.memory_space<vmem>>, %arg5: memref<64x1xf32, #tpu.memory_space<vmem>>, %arg6: memref<64x1xf32, #tpu.memory_space<vmem>>, %arg7: memref<1x1xf32, #tpu.memory_space<vmem>>, %arg8: memref<1x1x128xf32, #tpu.memory_space<vmem>>) attributes {dimension_semantics = [#tpu.dimension_semantics<parallel>], iteration_bounds = array<i64: 2>, scalar_prefetch = 0 : i64, scratch_operands = 0 : i64, tpu.core_type = #tpu.core_type<tc>, window_params = [{transform_indices = @transform_0, window_bounds = array<i64: 128, 50>}, {pipeline_mode = #tpu.pipeline_mode<synchronous>, transform_indices = @transform_1, window_bounds = array<i64: 64, 50>}, {pipeline_mode = #tpu.pipeline_mode<synchronous>, transform_indices = @transform_2, window_bounds = array<i64: 64, 1>}, {pipeline_mode = #tpu.pipeline_mode<synchronous>, transform_indices = @transform_3, window_bounds = array<i64: 64, 64>}, {pipeline_mode = #tpu.pipeline_mode<synchronous>, transform_indices = @transform_4, window_bounds = array<i64: 64, 1>}, {pipeline_mode = #tpu.pipeline_mode<synchronous>, transform_indices = @transform_5, window_bounds = array<i64: 64, 1>}, {pipeline_mode = #tpu.pipeline_mode<synchronous>, transform_indices = @transform_6, window_bounds = array<i64: 1, 1>}, {transform_indices = @transform_7, window_bounds = array<i64: 1, 1, 128>}]} {
    %c0 = arith.constant 0 : index
    %c0_0 = arith.constant 0 : index
    %0 = vector.load %arg1[%c0, %c0_0] : memref<128x50xbf16, #tpu.memory_space<vmem>>, vector<128x50xbf16>
    %c0_1 = arith.constant 0 : index
    %c0_2 = arith.constant 0 : index
    %1 = vector.load %arg2[%c0_1, %c0_2] : memref<64x50xbf16, #tpu.memory_space<vmem>>, vector<64x50xbf16>
    %cst = arith.constant dense<0.000000e+00> : vector<64x128xf32>
    %2 = tpu.matmul %1, %0, %cst {dimension_numbers = #tpu.dot_dimension_numbers<[1], [1], [0], [0], [0, 0, 1, 0], [], []>} : vector<64x50xbf16>, vector<128x50xbf16>, vector<64x128xf32> -> vector<64x128xf32>
    %c0_3 = arith.constant 0 : index
    %c0_4 = arith.constant 0 : index
    %3 = vector.load %arg3[%c0_3, %c0_4] : memref<64x1xf32, #tpu.memory_space<vmem>>, vector<64x1xf32>
    %4 = vector.broadcast %3 : vector<64x1xf32> to vector<64x128xf32>
    %5 = arith.addf %2, %4 : vector<64x128xf32>
    %cst_5 = arith.constant 0.000000e+00 : f32
    %6 = vector.broadcast %cst_5 : f32 to vector<64x128xf32>
    %7 = arith.maximumf %5, %6 : vector<64x128xf32>
    %c0_6 = arith.constant 0 : index
    %c0_7 = arith.constant 0 : index
    %8 = vector.load %arg4[%c0_6, %c0_7] : memref<64x64xbf16, #tpu.memory_space<vmem>>, vector<64x64xbf16>
    %9 = arith.truncf %7 : vector<64x128xf32> to vector<64x128xbf16>
    %cst_8 = arith.constant dense<0.000000e+00> : vector<64x128xf32>
    %10 = tpu.matmul %8, %9, %cst_8 {dimension_numbers = #tpu.dot_dimension_numbers<[1], [0], [0], [1], [0, 0, 1, 1], [], []>} : vector<64x64xbf16>, vector<64x128xbf16>, vector<64x128xf32> -> vector<64x128xf32>
    %c0_9 = arith.constant 0 : index
    %c0_10 = arith.constant 0 : index
    %11 = vector.load %arg5[%c0_9, %c0_10] : memref<64x1xf32, #tpu.memory_space<vmem>>, vector<64x1xf32>
    %12 = vector.broadcast %11 : vector<64x1xf32> to vector<64x128xf32>
    %13 = arith.addf %10, %12 : vector<64x128xf32>
    %cst_11 = arith.constant 0.000000e+00 : f32
    %14 = vector.broadcast %cst_11 : f32 to vector<64x128xf32>
    %15 = arith.maximumf %13, %14 : vector<64x128xf32>
    %c0_12 = arith.constant 0 : index
    %c0_13 = arith.constant 0 : index
    %16 = vector.load %arg6[%c0_12, %c0_13] : memref<64x1xf32, #tpu.memory_space<vmem>>, vector<64x1xf32>
    %17 = vector.broadcast %16 : vector<64x1xf32> to vector<64x128xf32>
    %18 = arith.mulf %15, %17 : vector<64x128xf32>
    %cst_14 = arith.constant dense<0.000000e+00> : vector<128xf32>
    %19 = vector.multi_reduction <add>, %18, %cst_14 [0] : vector<64x128xf32> to vector<128xf32>
    %20 = vector.shape_cast %19 : vector<128xf32> to vector<1x128xf32>
    %c0_15 = arith.constant 0 : index
    %c0_16 = arith.constant 0 : index
    %21 = vector.load %arg7[%c0_15, %c0_16] : memref<1x1xf32, #tpu.memory_space<vmem>>, vector<1x1xf32>
    %22 = vector.broadcast %21 : vector<1x1xf32> to vector<1x128xf32>
    %23 = arith.addf %20, %22 : vector<1x128xf32>
    %c0_17 = arith.constant 0 : index
    %c0_18 = arith.constant 0 : index
    %c0_19 = arith.constant 0 : index
    %24 = vector.load %arg8[%c0_17, %c0_18, %c0_19] : memref<1x1x128xf32, #tpu.memory_space<vmem>>, vector<1x1x128xf32>
    %25 = vector.shape_cast %24 : vector<1x1x128xf32> to vector<1x128xf32>
    %26 = vector.shape_cast %23 : vector<1x128xf32> to vector<1x1x128xf32>
    tpu.vector_store %arg8[%c0_17, %c0_18, %c0_19], %26 {strides = array<i32>} : memref<1x1x128xf32, #tpu.memory_space<vmem>>, vector<1x1x128xf32>,
    return
  }
  func.func @transform_0(%arg0: i32) -> (i32, i32) {
    %c0_i32 = arith.constant 0 : i32
    %c0_i32_0 = arith.constant 0 : i32
    return %arg0, %c0_i32 : i32, i32
  }
  func.func @transform_1(%arg0: i32) -> (i32, i32) {
    %c0_i32 = arith.constant 0 : i32
    %c0_i32_0 = arith.constant 0 : i32
    %c0_i32_1 = arith.constant 0 : i32
    return %c0_i32, %c0_i32_0 : i32, i32
  }
  func.func @transform_2(%arg0: i32) -> (i32, i32) {
    %c0_i32 = arith.constant 0 : i32
    %c0_i32_0 = arith.constant 0 : i32
    %c0_i32_1 = arith.constant 0 : i32
    return %c0_i32, %c0_i32_0 : i32, i32
  }
  func.func @transform_3(%arg0: i32) -> (i32, i32) {
    %c0_i32 = arith.constant 0 : i32
    %c0_i32_0 = arith.constant 0 : i32
    %c0_i32_1 = arith.constant 0 : i32
    return %c0_i32, %c0_i32_0 : i32, i32
  }
  func.func @transform_4(%arg0: i32) -> (i32, i32) {
    %c0_i32 = arith.constant 0 : i32
    %c0_i32_0 = arith.constant 0 : i32
    %c0_i32_1 = arith.constant 0 : i32
    return %c0_i32, %c0_i32_0 : i32, i32
  }
  func.func @transform_5(%arg0: i32) -> (i32, i32) {
    %c0_i32 = arith.constant 0 : i32
    %c0_i32_0 = arith.constant 0 : i32
    %c0_i32_1 = arith.constant 0 : i32
    return %c0_i32, %c0_i32_0 : i32, i32
  }
  func.func @transform_6(%arg0: i32) -> (i32, i32) {
    %c0_i32 = arith.constant 0 : i32
    %c0_i32_0 = arith.constant 0 : i32
    %c0_i32_1 = arith.constant 0 : i32
    return %c0_i32, %c0_i32_0 : i32, i32
  }
  func.func @transform_7(%arg0: i32) -> (i32, i32, i32) {
    %c0_i32 = arith.constant 0 : i32
    %c0_i32_0 = arith.constant 0 : i32
    %c0_i32_1 = arith.constant 0 : i32
    return %arg0, %c0_i32, %c0_i32_0 : i32, i32, i32
  }
}

</mosaic_0001>

<bundles_post_ra>
// kernel: _lambda_.1
= control target key start
LH: loop header
LB: loop body
LE: loop exit
PB: predicated region body
PF: predicated region fallthrough
CT: control target
= control target key end

     0   :  { %s1228_s0 = inlined_call_operand.vmem [shape: bf16[256,50], index: 0, kind: input, shape index: {}]   ;;  %s1229_s1 = inlined_call_operand.vmem [shape: bf16[64,50], index: 1, kind: input, shape index: {}]   ;;  %s1230_s2 = inlined_call_operand.vmem [shape: f32[64,1], index: 2, kind: input, shape index: {}]   ;;  %s1231_s3 = inlined_call_operand.vmem [shape: bf16[64,64], index: 3, kind: input, shape index: {}]   ;;  %s1232_s4 = inlined_call_operand.vmem [shape: f32[64,1], index: 4, kind: input, shape index: {}]   ;;  %s1233_s5 = inlined_call_operand.vmem [shape: f32[64,1], index: 5, kind: input, shape index: {}]   ;;  %s1234_s6 = inlined_call_operand.<no memory space> [shape: f32[1,1], index: 6, kind: input, shape index: {}]   ;;  %s1235_s7 = inlined_call_operand.hbm [shape: f32[2,1,128], index: 7, kind: output, shape index: {}]  }
   0x1   :  { %v12_v0 = vstv %s1234_s6 }
   0x2   :  { %13 = vst [vmem:[#allocation2] sm:$0x1] %v12_v0 }
   0x3   :  { %14 = vsyncpa [#allocation4], 0 }
   0x4   :  { %16 = vsyncpa [#allocation4 + $0x1], 0  ;;  %s1026_s26 = smov 0   ;;  %s1028_s27 = smov 0  }
   0x5   :  { %s1030_s28 = smov 0   ;;  %s1032_s29 = smov 0  }
   0x6 LB: > { %s1047_s6 = sadd.s32 4294967295, %s980_s29   ;;  %s763_s30 = sadd.s32 4294967294, %s980_s29   ;;  %s980_s29 = sphi %s1032_s29, %s1241_s29   ;;  %s976_s28 = sphi %s1030_s28, %s1240_s28   ;;  %s972_s27 = sphi %s1028_s27, %s1239_s27   ;;  %s968_s26 = sphi %s1026_s26, %s1238_s26  }
   0x7   : > { %s1051_s8 = sadd.s32 1, %s980_s29   ;;  %s181_s9 = sadd.s32 1, %s976_s28 }
   0x8   : > { %s178_s10 = ssub.s32 %s980_s29, %s1051_s8  ;;  %p191_p0 = scmp.ne.s32.totalorder %s976_s28, %s972_s27 }
   0x9   : > { %p179_p1 = scmp.eq.s32.totalorder %s178_s10, 0  ;;  %p192_p2 = scmp.eq.s32.totalorder %s1047_s6, 1 }
   0xa   : > { %p197_p3 = scmp.ne.s32.totalorder %s972_s27, %s968_s26  ;;  %p198_p4 = scmp.eq.s32.totalorder %s763_s30, 1 }
   0xb   : > { %s1062_s11 = scalar_select %p179_p1, %s976_s28, %s181_s9  }
   0xc   : > { %p1064_p5 = por %p192_p2, %p191_p0  ;;  %p1068_p6 = por %p198_p4, %p197_p3 }
   0xd   : > { %p766_p7 = scmp.ge.s32.totalorder %s980_s29, 1  ;;  %p243_p8 = scmp.lt.s32.totalorder %s980_s29, 3 }
   0xf   : > { %p244_p9 = pnand %p766_p7, %p243_p8 }
  0x10   : > { %s767_s14 = sshll.u32 (!%p244_p9), %s1047_s6, 4  ;;  %s272_s25 = sand.u32 (!%p244_p9), 1, %s972_s27  }
  0x11   : > { %247 = sbr.rel (%p244_p9) target bundleno = 474 (0x1da), region = 48  ;;  %p275_p10 = scmp.lt.s32.totalorder (!%p244_p9), %s767_s14, 31 }
  0x12   : > { %s704_s9 = scalar_lea.hbm (!%p244_p9), %s1235_s7, %s1047_s6  ;;  %s273_s10 = scalar_lea.vmem (!%p244_p9), [#allocation3], %s272_s25 }
  0x13   : > { %s708_s15 = sshll.u32 (!%p244_p9), %s704_s9, 4  ;;  %s696_s16 = scalar_lea.sflag (!%p244_p9), [#allocation4], %s272_s25  ;;  %s709_s15 = int_to_ptr.hbm [resolvable:$true] %s708_s15 }
  0x14   : > { %s938_s21 = scalar_lea.hbm (!%p244_p9), %s1235_s7, 2 }
  0x16   : > { %v311_v1 = vld [vmem:[%s1230_s2 + $0x30] sm:$0xff]  ;;  %s1243_s14 = smov (!%p275_p10, %s767_s14), 31  ;;  %v982_v2 = vmov 0   ;;  %vm413_vm0 = vcmask 408576   ;;  %v312_v5 = vld [vmem:[%s1230_s2 + $0x38] sm:$0xff]  ;;  %v309_v8 = vld [vmem:[%s1230_s2 + $0x20] sm:$0xff] }
  0x17   : > { %915 = vset.pattern.permute.xlu0 %v982_v2  ;;  %916 = vset.pattern.permute.xlu1 %v982_v2  ;;  %s768_s17 = sshll.u32 %s1243_s14, 2  ;;  %v305_v9 = vld [vmem:[%s1230_s2] sm:$0xff]  ;;  %v310_v12 = vld [vmem:[%s1230_s2 + $0x28] sm:$0xff]  ;;  %v501_v20 = vld [vmem:[%s1232_s4 + $0x10] sm:$0xff]  ;;  %vm567_vm1 = vcmask 523264   ;;  %s706_s14 = sshll.u32 %s273_s10, 4  ;;  %s707_s14 = int_to_ptr.vmem [resolvable:$true] %s706_s14 }
  0x18   : > { %345 = vperm.xlu0 %915, %v311_v1   ;;  %917 = vset.pattern.permute.xlu2 %v982_v2  ;;  %s1081_s20 = scalar_lea.vmem %s1228_s0, %s768_s17  ;;  %v500_v13 = vld [vmem:[%s1232_s4 + $0x8] sm:$0xff]  ;;  %v503_v19 = vld [vmem:[%s1232_s4 + $0x20] sm:$0xff]  ;;  %v307_v21 = vld [vmem:[%s1230_s2 + $0x10] sm:$0xff]  ;;  %s932_s17 = sshra.s32 %s709_s15, 4  ;;  %s933_s17 = int_to_ptr.hbm [resolvable:$true] %s932_s17 }
  0x19   : > { %v850_v3 = vld [vmem:[%s1081_s20 + $0x38] sm:$0xff]  ;;  %v849_v6 = vld [vmem:[%s1081_s20 + $0x30] sm:$0xff]  ;;  %v848_v10 = vld [vmem:[%s1081_s20 + $0x28] sm:$0xff]  ;;  %335 = vperm.xlu1 %916, %v309_v8   ;;  %325 = vperm.xlu2 %917, %v307_v21   ;;  %s934_s18 = scalar_lea.hbm %s933_s17, 1  ;;  %p939_p0 = scmp.lt.s32.totalorder %s933_s17, %s1235_s7 }
  0x1a   : > { %v448_v4 = vsel %vm413_vm0, %v850_v3, 0  ;;  %v445_v7 = vsel %vm413_vm0, %v849_v6, 0  ;;  %v442_v11 = vsel %vm413_vm0, %v848_v10, 0  ;;  %v847_v14 = vld [vmem:[%s1081_s20 + $0x20] sm:$0xff]  ;;  %v306_v16 = vld [vmem:[%s1230_s2 + $0x8] sm:$0xff]  ;;  %v846_v17 = vld [vmem:[%s1081_s20 + $0x18] sm:$0xff]  ;;  %p935_p11 = scmp.ne.s32.totalorder %s933_s17, %s934_s18  ;;  %p940_p1 = scmp.lt.s32.totalorder %s938_s21, %s934_s18 }
  0x1b   : > { %860 = vmatpush.bf16.xpose.msra.mxu3 %v448_v4  ;;  %450 = vmatpush.bf16.xpose.msra.mxu0 %v448_v4  ;;  %v439_v15 = vsel %vm413_vm0, %v847_v14, 0  ;;  %v436_v18 = vsel %vm413_vm0, %v846_v17, 0  ;;  %v845_v22 = vld [vmem:[%s1081_s20 + $0x10] sm:$0xff]  ;;  %v618_v24 = vld [vmem:[%s1233_s5 + $0x8] sm:$0xff]  ;;  %v308_v28 = vld [vmem:[%s1230_s2 + $0x18] sm:$0xff] }
  0x1c   : > { %859 = vmatpush.bf16.xpose.msra.mxu2 %v448_v4  ;;  %v433_v23 = vsel %vm413_vm0, %v845_v22, 0  ;;  %v504_v25 = vld [vmem:[%s1232_s4 + $0x28] sm:$0xff]  ;;  %v505_v29 = vld [vmem:[%s1232_s4 + $0x30] sm:$0xff]  ;;  %v843_v31 = vld [vmem:[%s1081_s20] sm:$0xff]  ;;  %p936_p12 = pnand %p935_p11, %p1064_p5  ;;  %p941_p2 = por %p940_p1, %p939_p0 }
  0x1d   : > { %v844_v26 = vld [vmem:[%s1081_s20 + $0x8] sm:$0xff]  ;;  %v619_v30 = vld [vmem:[%s1233_s5 + $0x10] sm:$0xff]  ;;  %v427_v32 = vsel %vm413_vm0, %v843_v31, 0  ;;  %v499_v33 = vld [vmem:[%s1232_s4] sm:$0xff] }
  0x1e   : > { %v430_v27 = vsel %vm413_vm0, %v844_v26, 0  ;;  %v622_v34 = vld [vmem:[%s1233_s5 + $0x28] sm:$0xff]  ;;  %v621_v35 = vld [vmem:[%s1233_s5 + $0x20] sm:$0xff]  ;;  %v853_v36 = vld [vmem:[%s1229_s1 + $0x10] sm:$0xff]  ;;  %p937_p13 = pneg %p936_p12 }
  0x1f   : > { %v851_v37 = vld [vmem:[%s1229_s1] sm:$0xff]  ;;  %v852_v38 = vld [vmem:[%s1229_s1 + $0x8] sm:$0xff]  ;;  %v502_v39 = vld [vmem:[%s1232_s4 + $0x18] sm:$0xff] }
  0x20   : > { %350 = vperm.xlu0 %915, %v312_v5   ;;  %v686_v40 = vld [vmem:[#allocation2] sm:$0x1]  ;;  %v623_v41 = vld [vmem:[%s1233_s5 + $0x30] sm:$0xff]  ;;  %v854_v43 = vld [vmem:[%s1229_s1 + $0x18] sm:$0xff]  ;;  %p942_p3 = pnand %p941_p2, %p937_p13 }
  0x21   : > { %340 = vperm.xlu1 %916, %v310_v12   ;;  %330 = vperm.xlu2 %917, %v308_v28   ;;  %v617_v42 = vld [vmem:[%s1233_s5] sm:$0xff]  ;;  %v620_v44 = vld [vmem:[%s1233_s5 + $0x18] sm:$0xff]  ;;  %v857_v21 = vld [vmem:[%s1231_s3 + $0x10] sm:$0xff] }
  0x22   : > { %v506_v45 = vld [vmem:[%s1232_s4 + $0x38] sm:$0xff] }
  0x23   : > { %862 = vmatpush.bf16.xpose.msra.mxu3 %v445_v7  ;;  %451 = vmatpush.bf16.xpose.msra.mxu0 %v445_v7  ;;  %v624_v46 = vld [vmem:[%s1233_s5 + $0x38] sm:$0xff] }
  0x24   : > { %861 = vmatpush.bf16.xpose.msra.mxu2 %v445_v7  ;;  %v858_v22 = vld [vmem:[%s1231_s3 + $0x18] sm:$0xff] }
  0x28   : > { %315 = vperm.xlu0 %915, %v305_v9  }
  0x29   : > { %320 = vperm.xlu1 %916, %v306_v16   ;;  %509 = vperm.xlu2 %917, %v499_v33  }
  0x2b   : > { %864 = vmatpush.bf16.xpose.msra.mxu3 %v442_v11  ;;  %452 = vmatpush.bf16.xpose.msra.mxu0 %v442_v11 }
  0x2c   : > { %863 = vmatpush.bf16.xpose.msra.mxu2 %v442_v11 }
  0x30   : > { %514 = vperm.xlu0 %915, %v500_v13  }
  0x31   : > { %519 = vperm.xlu1 %916, %v501_v20   ;;  %524 = vperm.xlu2 %917, %v502_v39   ;;  %v856_v20 = vld [vmem:[%s1231_s3 + $0x8] sm:$0xff] }
  0x33   : > { %866 = vmatpush.bf16.xpose.msra.mxu3 %v439_v15  ;;  %453 = vmatpush.bf16.xpose.msra.mxu0 %v439_v15 }
  0x34   : > { %865 = vmatpush.bf16.xpose.msra.mxu2 %v439_v15 }
  0x38   : > { %529 = vperm.xlu0 %915, %v503_v19   ;;  %v855_v19 = vld [vmem:[%s1231_s3] sm:$0xff] }
  0x39   : > { %534 = vperm.xlu1 %916, %v504_v25   ;;  %627 = vperm.xlu2 %917, %v617_v42  }
  0x3b   : > { %868 = vmatpush.bf16.xpose.msra.mxu3 %v436_v18  ;;  %454 = vmatpush.bf16.xpose.msra.mxu0 %v436_v18 }
  0x3c   : > { %867 = vmatpush.bf16.xpose.msra.mxu2 %v436_v18 }
  0x40   : > { %632 = vperm.xlu0 %915, %v618_v24  }
  0x41   : > { %637 = vperm.xlu1 %916, %v619_v30   ;;  %642 = vperm.xlu2 %917, %v620_v44  }
  0x43   : > { %870 = vmatpush.bf16.xpose.msra.mxu3 %v433_v23  ;;  %455 = vmatpush.bf16.xpose.msra.mxu0 %v433_v23 }
  0x44   : > { %869 = vmatpush.bf16.xpose.msra.mxu2 %v433_v23 }
  0x48   : > { %539 = vperm.xlu0 %915, %v505_v29  }
  0x49   : > { %647 = vperm.xlu1 %916, %v621_v35   ;;  %544 = vperm.xlu2 %917, %v506_v45  }
  0x4b   : > { %872 = vmatpush.bf16.xpose.msra.mxu3 %v430_v27  ;;  %456 = vmatpush.bf16.xpose.msra.mxu0 %v430_v27 }
  0x4c   : > { %871 = vmatpush.bf16.xpose.msra.mxu2 %v430_v27 }
  0x50   : > { %652 = vperm.xlu0 %915, %v622_v34  }
  0x51   : > { %657 = vperm.xlu1 %916, %v623_v41   ;;  %662 = vperm.xlu2 %917, %v624_v46  }
  0x53   : > { %874 = vmatpush.bf16.xpose.msra.mxu3 %v427_v32  ;;  %457 = vmatpush.bf16.xpose.msra.mxu0 %v427_v32 }
  0x54   : > { %873 = vmatpush.bf16.xpose.msra.mxu2 %v427_v32 }
  0x58   : > { %689 = vperm.xlu0 %915, %v686_v40  }
  0x5a   : > { %819 = vmatmul.msk.bf16.vlgmr.msra.gmra.mxu3 %vm413_vm0, %v853_v36  ;;  %817 = vmatmul.msk.bf16.vlgmr.msra.gmra.mxu0 %vm413_vm0, %v851_v37 }
  0x5b   : > { %818 = vmatmul.msk.bf16.vlgmr.msra.gmra.mxu2 %vm413_vm0, %v852_v38 }
  0x6a   : > { %820 = vmatmul.msk.bf16.gmra.mxu3 %vm413_vm0, %v854_v43 }
  0x73   : > { %v326_v53 = vpop.permute.xlu2 %325 }
  0x7b   : > { %v331_v1 = vpop.permute.xlu2 %330 }
  0x83   : > { %v510_v25 = vpop.permute.xlu2 %509 }
  0x8a   : > { %v346_v49 = vpop.permute.xlu0 %345 }
  0x8b   : > { %v336_v50 = vpop.permute.xlu1 %335  ;;  %v525_v29 = vpop.permute.xlu2 %524 }
  0x92   : > { %v351_v55 = vpop.permute.xlu0 %350 }
  0x93   : > { %v341_v56 = vpop.permute.xlu1 %340  ;;  %v628_v33 = vpop.permute.xlu2 %627 }
  0x9a   : > { %v316_v7 = vpop.permute.xlu0 %315 }
  0x9b   : > { %v321_v9 = vpop.permute.xlu1 %320  ;;  %v643_v38 = vpop.permute.xlu2 %642 }
  0xa2   : > { %v515_v26 = vpop.permute.xlu0 %514 }
  0xa3   : > { %v520_v27 = vpop.permute.xlu1 %519 }
  0xaa   : > { %v530_v30 = vpop.permute.xlu0 %529 }
  0xab   : > { %v535_v32 = vpop.permute.xlu1 %534 }
  0xb2   : > { %v633_v35 = vpop.permute.xlu0 %632 }
  0xb3   : > { %v638_v36 = vpop.permute.xlu1 %637 }
  0xba   : > { %v540_v44 = vpop.permute.xlu0 %539 }
  0xd7   : > { %v459_v54 = vpop.f32.mrf.mxu0 }
  0xd8   : > { %v460_v10 = vadd.f32 %v459_v54, %v316_v7 }
  0xda   : > { %v479_v15 = vmax.f32 %v460_v10, 0.0 }
  0xdd   : > { %v469_v47 = vpop.f32.mrf.mxu3 }
  0xde   : > { %v464_v51 = vpop.f32.mrf.mxu2  ;;  %v470_v62 = vadd.f32 %v469_v47, %v336_v50 }
  0xdf   : > { %v465_v3 = vadd.f32 %v464_v51, %v326_v53  ;;  %v461_v6 = vpop.f32.mrf.mxu0 }
  0xe0   : > { %v483_v8 = vmax.f32 %v470_v62, 0.0  ;;  %v462_v11 = vadd.f32 %v461_v6, %v321_v9 }
  0xe1   : > { %v481_v12 = vmax.f32 %v465_v3, 0.0 }
  0xe2   : > { %v480_v16 = vmax.f32 %v462_v11, 0.0 }
  0xe4   : > { %v495_v18 = vpack.c.bf16 %v480_v16, %v479_v15 }
  0xe5   : > { %v471_v48 = vpop.f32.mrf.mxu3 }
  0xe6   : > { %v472_v59 = vadd.f32 %v471_v48, %v341_v56  ;;  %v466_v61 = vpop.f32.mrf.mxu2  ;;  %v648_v48 = vpop.permute.xlu1 %647 }
  0xe7   : > { %v467_v4 = vadd.f32 %v466_v61, %v331_v1 }
  0xe8   : > { %v484_v2 = vmax.f32 %v472_v59, 0.0 }
  0xe9   : > { %v482_v13 = vmax.f32 %v467_v4, 0.0 }
  0xea   : > { %v497_v14 = vpack.c.bf16 %v484_v2, %v483_v8 }
  0xeb   : > { %v496_v17 = vpack.c.bf16 %v482_v13, %v481_v12 }
  0xed   : > { %v474_v52 = vpop.f32.mrf.mxu3 }
  0xee   : > { %v475_v57 = vadd.f32 %v474_v52, %v346_v49  ;;  %v658_v3 = vpop.permute.xlu1 %657 }
  0xf0   : > { %v485_v63 = vmax.f32 %v475_v57, 0.0  ;;  %v545_v57 = vpop.permute.xlu2 %544 }
  0xf5   : > { %v476_v58 = vpop.f32.mrf.mxu3 }
  0xf6   : > { %v477_v60 = vadd.f32 %v476_v58, %v351_v55 }
  0xf8   : > { %v486_v0 = vmax.f32 %v477_v60, 0.0  ;;  %v663_v10 = vpop.permute.xlu2 %662 }
  0xfa   : > { %v498_v5 = vpack.c.bf16 %v486_v0, %v485_v63  ;;  %v653_v0 = vpop.permute.xlu0 %652 }
  0xfc   : > { %584 = vmatpush.bf16.msra.mxu1 %v498_v5 }
 0x100   : > { %585 = vmatpush.bf16.msra.mxu1 %v497_v14 }
 0x104   : > { %586 = vmatpush.bf16.msra.mxu1 %v496_v17 }
 0x108   : > { %587 = vmatpush.bf16.msra.mxu1 %v495_v18  ;;  %v690_v18 = vpop.permute.xlu0 %689 }
 0x10b   : > { %837 = vmatmul.msk.bf16.vlgmr.msra.gmra.mxu1 %vm567_vm1, %v855_v19 }
 0x11b   : > { %838 = vmatmul.msk.bf16.gmra.mxu1 %vm567_vm1, %v856_v20  ;;  %v692_v20 = vperm.slane %v690_v18, 0 }
 0x12b   : > { %839 = vmatmul.msk.bf16.gmra.mxu1 %vm567_vm1, %v857_v21 }
 0x13b   : > { %840 = vmatmul.msk.bf16.gmra.mxu1 %vm567_vm1, %v858_v22 }
 0x188   : > { %v589_v23 = vpop.f32.mrf.mxu1 }
 0x189   : > { %v590_v40 = vadd.f32 %v589_v23, %v510_v25 }
 0x18b   : > { %v609_v45 = vmax.f32 %v590_v40, 0.0 }
 0x18d   : > { %v665_v53 = vmul.f32 %v628_v33, %v609_v45 }
 0x190   : > { %v591_v24 = vpop.f32.mrf.mxu1 }
 0x191   : > { %v592_v37 = vadd.f32 %v591_v24, %v515_v26 }
 0x193   : > { %v610_v42 = vmax.f32 %v592_v37, 0.0 }
 0x195   : > { %v666_v49 = vmul.f32 %v633_v35, %v610_v42 }
 0x197   : > { %v673_v58 = vadd.f32 %v666_v49, %v665_v53 }
 0x198   : > { %v594_v28 = vpop.f32.mrf.mxu1 }
 0x199   : > { %v595_v41 = vadd.f32 %v594_v28, %v520_v27 }
 0x19b   : > { %v611_v46 = vmax.f32 %v595_v41, 0.0 }
 0x19d   : > { %v667_v54 = vmul.f32 %v638_v36, %v611_v46 }
 0x19f   : > { %v674_v61 = vadd.f32 %v673_v58, %v667_v54 }
 0x1a0   : > { %v596_v31 = vpop.f32.mrf.mxu1 }
 0x1a1   : > { %v597_v43 = vadd.f32 %v596_v31, %v525_v29 }
 0x1a3   : > { %v612_v50 = vmax.f32 %v597_v43, 0.0 }
 0x1a5   : > { %v668_v59 = vmul.f32 %v643_v38, %v612_v50 }
 0x1a7   : > { %v675_v1 = vadd.f32 %v674_v61, %v668_v59 }
 0x1a8   : > { %v599_v34 = vpop.f32.mrf.mxu1 }
 0x1a9   : > { %v600_v47 = vadd.f32 %v599_v34, %v530_v30 }
 0x1ab   : > { %v613_v55 = vmax.f32 %v600_v47, 0.0 }
 0x1ad   : > { %v669_v62 = vmul.f32 %v648_v48, %v613_v55 }
 0x1af   : > { %v676_v5 = vadd.f32 %v675_v1, %v669_v62 }
 0x1b0   : > { %v601_v39 = vpop.f32.mrf.mxu1 }
 0x1b1   : > { %v602_v51 = vadd.f32 %v601_v39, %v535_v32 }
 0x1b3   : > { %v614_v60 = vmax.f32 %v602_v51, 0.0 }
 0x1b5   : > { %v670_v2 = vmul.f32 %v653_v0, %v614_v60 }
 0x1b7   : > { %v677_v8 = vadd.f32 %v676_v5, %v670_v2 }
 0x1b8   : > { %v604_v52 = vpop.f32.mrf.mxu1 }
 0x1b9   : > { %v605_v56 = vadd.f32 %v604_v52, %v540_v44 }
 0x1bb   : > { %v615_v63 = vmax.f32 %v605_v56, 0.0 }
 0x1bd   : > { %v671_v6 = vmul.f32 %v658_v3, %v615_v63 }
 0x1bf   : > { %v678_v11 = vadd.f32 %v677_v8, %v671_v6 }
 0x1c0   : > { %v606_v4 = vpop.f32.mrf.mxu1 }
 0x1c1   : > { %v607_v7 = vadd.f32 %v606_v4, %v545_v57 }
 0x1c3   : > { %v616_v9 = vmax.f32 %v607_v7, 0.0 }
 0x1c5   : > { %v672_v12 = vmul.f32 %v663_v10, %v616_v9 }
 0x1c7   : > { %v679_v13 = vadd.f32 %v678_v11, %v672_v12 }
 0x1c9   : > { %v680_v14 = vrot.slane %v679_v13, 4 }
 0x1cb   : > { %v681_v15 = vadd.f32 %v680_v14, %v679_v13 }
 0x1cd   : > { %v682_v16 = vrot.slane %v681_v15, 2 }
 0x1cf   : > { %v683_v17 = vadd.f32 %v682_v16, %v681_v15 }
 0x1d1   : > { %v684_v19 = vrot.slane %v683_v17, 1 }
 0x1d3   : > { %v685_v21 = vadd.f32 %v684_v19, %v683_v17 }
 0x1d5   : > { %v693_v22 = vadd.f32 %v692_v20, %v685_v21 }
 0x1d7   : > { %694 = vst [vmem:[%s273_s10] sm:$0x1] %v693_v22 }
 0x1d8   : > { %945 = shalt.err (!%p942_p3)
}
 0x1d9   : > { %875 = dma.vmem_to_hbm [thread:$0]  (%p1064_p5), %s707_s14, 16, %s709_s15, %s696_s16  }
 0x1da PF: > { %p881_p4 = scmp.ge.s32.totalorder %s980_s29, 2  ;;  %s720_s24 = sand.u32 1, %s968_s26  }
 0x1db   : > { %s721_s25 = scalar_lea.sflag [#allocation4], %s720_s24 }
 0x1dc   : > { %p878_p7 = pnand %p881_p4, %p1068_p6 }
 0x1de   : > { %p879_p8 = pneg %p878_p7 }
 0x1e0   : > { %963 = dma.done.wait (%p879_p8), %s721_s25, 16  }
 0x1e1   : > { %965 = vsyncadd (%p879_p8), %s721_s25, 4294967280  ;;  %p19_p9 = scmp.ge.s32.totalorder %s1051_s8, 4   ;;  %s1238_s26 = smov %s972_s27 }
 0x1e2   : > { %s1239_s27 = smov %s976_s28  ;;  %s1240_s28 = smov %s1062_s11 }
 0x1e3   : > { %s1241_s29 = smov %s1051_s8  ;;  %21 = sbr.rel (!%p19_p9) target bundleno = 6 (0x6), region = 83 }
 0x1e8   :  { %726 = vsyncpa [#allocation4], 1 }
 0x1e9   :  { %728 = vsyncpa [#allocation4 + $0x1], 1 }

</bundles_post_ra>
